<compile_context>
chip_gen: v7x
topology: tpu7x:2x2x1
jax: 0.10.0
libtpu: 0.0.40
codegen_flags: <defaults>
</compile_context>

<pallas_src>
import jax
import jax.numpy as jnp
from jax.experimental import pallas as pl
from jax.experimental.pallas import tpu as pltpu

ALPHA = 1.0
GAMMA = 2.0          # kernel hard-codes gamma == 2 -> explicit square (no pow)
EPS = 1e-6
HARD_LABELS = True   # segmentation masks are 0/1 -> fold alpha_t / p_t algebra

LANES = 128
MAX_ROW_TILE = 4096  # (4096,128) f32 = 2 MiB per input tile
NCORES = 2           # leading "parallel" axis; ~2x on v7x, harmless on 1-TC chips
VMEM_LIMIT_BYTES = 32 * 1024 * 1024


def _cdiv(a, b):
    return -(-a // b)


def _round_up(a, b):
    return (a + b - 1) // b * b


def _make_kernel(steps, row_tile, rows_raw, total, elem_mask, row_mask):
    """Builds the focal-loss kernel closed over static tiling constants."""

    def kernel(x_ref, t_ref, out_ref, acc_ref):
        c = pl.program_id(0)
        i = pl.program_id(1)

        @pl.when(i == 0)
        def _init():
            acc_ref[...] = jnp.zeros_like(acc_ref)

        # Native-dtype loads; f32 stays f32 (astype is a no-op), bf16 inputs get
        # one cheap in-kernel convert instead of a wrapper-side HBM pass.
        x = x_ref[...].astype(jnp.float32)
        t = t_ref[...].astype(jnp.float32)

        # inputs.clamp(min=-20, max=20)
        x = jnp.clip(x, -20.0, 20.0)

        # Shared exp: e = exp(-|x|) feeds both sigmoid and the stable BCE term.
        e = jnp.exp(-jnp.abs(x))                     # EUP
        r = pl.reciprocal(1.0 + e, approx=True)      # EUP vrcp (otherwise-idle slot)

        # F.binary_cross_entropy_with_logits, reduction='none' (stable form).
        ce = jnp.maximum(x, 0.0) - x * t + jnp.log1p(e)

        if HARD_LABELS and ALPHA == 1.0:
            # Hard 0/1 labels + alpha == 1: alpha_t == t, and for t == 1 we have
            # 1 - p_t == 1 - sigmoid(x); for t == 0 the loss is zero anyway.
            q = jnp.where(x >= 0.0, e * r, r)        # 1 - sigmoid(x)
            w = jnp.maximum(q, EPS)
            loss = t * ((w * w) * ce)
        else:
            # Full (soft-label / general-alpha) form.
            p = jnp.where(x >= 0.0, r, e * r)        # sigmoid(x)
            p_t = p * t + (1.0 - p) * (1.0 - t)
            w = jnp.maximum(1.0 - p_t, EPS)
            loss = (w * w) * ce
            if ALPHA >= 0.0:
                loss = (ALPHA * t + (1.0 - ALPHA) * (1.0 - t)) * loss

        # Tail masking: the index_map clamps the *physical* block in-bounds, so
        # logical blocks past the data re-read the last block; masking by the
        # *logical* offset makes their contribution (and any garbage rows of a
        # partial last block) exactly zero.  Traced in only when padding exists.
        block = c * steps + i
        if elem_mask:
            start = block * (row_tile * LANES)
            idx = (jax.lax.broadcasted_iota(jnp.int32, (row_tile, LANES), 0) * LANES
                   + jax.lax.broadcasted_iota(jnp.int32, (row_tile, LANES), 1))
            loss = jnp.where(idx < (total - start), loss, 0.0)
        elif row_mask:
            start = block * row_tile
            ridx = jax.lax.broadcasted_iota(jnp.int32, (row_tile, LANES), 0)
            loss = jnp.where(ridx < (rows_raw - start), loss, 0.0)

        # Partial reduce (row_tile,128) -> (8,128); cheap VPU adds per tile.
        # The single tiny cross-lane reduce happens once in the wrapper.
        acc_ref[...] += loss.reshape(-1, 8, LANES).sum(axis=0)

        @pl.when(i == pl.num_programs(1) - 1)
        def _finalize():
            out_ref[...] = acc_ref[...].reshape(1, 8, LANES)

    return kernel


@jax.jit
def focal_loss(inputs, targets):
    """Sum-reduced binary focal loss over raw logits. Returns a scalar f32."""
    assert inputs.shape == targets.shape
    total = inputs.size
    rows_raw = _cdiv(total, LANES)
    rem = total % LANES

    if rem:
        # TODO(synk): rare path (numel not a multiple of 128) -> one small pad
        # copy; pad values are dead (element-level mask in-kernel).
        x2d = jnp.pad(inputs.reshape(-1), (0, LANES - rem)).reshape(rows_raw, LANES)
        t2d = jnp.pad(targets.reshape(-1), (0, LANES - rem)).reshape(rows_raw, LANES)
    else:
        # Contiguous row-major reshape: layout-preserving, no HBM copy.
        x2d = inputs.reshape(rows_raw, LANES)
        t2d = targets.reshape(rows_raw, LANES)

    # Clamp the tile for small inputs so the grid doesn't over-pad (multiple of
    # 16 sublanes keeps bf16 inputs legal too).
    row_tile = min(MAX_ROW_TILE, _round_up(_cdiv(rows_raw, NCORES), 16))
    nblocks = _cdiv(rows_raw, row_tile)
    ncores = NCORES if nblocks >= NCORES else 1
    steps = _cdiv(nblocks, ncores)
    last_block = nblocks - 1

    covered_rows = ncores * steps * row_tile
    elem_mask = rem != 0
    row_mask = (not elem_mask) and (covered_rows > rows_raw)

    kernel = _make_kernel(steps, row_tile, rows_raw, total, elem_mask, row_mask)

    def in_map(c, i):
        # Clamp so the DMA never targets a fully out-of-bounds block; the
        # kernel's logical-offset mask discards the duplicated read.
        return (jnp.minimum(c * steps + i, last_block), 0)

    partials = pl.pallas_call(
        kernel,
        out_shape=jax.ShapeDtypeStruct((ncores, 8, LANES), jnp.float32),
        grid_spec=pltpu.PrefetchScalarGridSpec(
            num_scalar_prefetch=0,
            grid=(ncores, steps),
            in_specs=[
                pl.BlockSpec((row_tile, LANES), in_map),
                pl.BlockSpec((row_tile, LANES), in_map),
            ],
            out_specs=pl.BlockSpec((1, 8, LANES), lambda c, i: (c, 0, 0)),
            scratch_shapes=[pltpu.VMEM((8, LANES), jnp.float32)],
        ),
        compiler_params=pltpu.CompilerParams(
            dimension_semantics=("parallel", "arbitrary"),
            vmem_limit_bytes=VMEM_LIMIT_BYTES,
        ),
    )(x2d, t2d)

    # One cheap final cross-lane reduce outside the kernel.
    return jnp.sum(partials)


def _focal_loss_ref(inputs, targets):
    x = jnp.clip(inputs.astype(jnp.float32), -20.0, 20.0)
    t = targets.astype(jnp.float32)
    p = jax.nn.sigmoid(x)
    ce = jnp.maximum(x, 0.0) - x * t + jnp.log1p(jnp.exp(-jnp.abs(x)))
    p_t = p * t + (1.0 - p) * (1.0 - t)
    loss = jnp.maximum(1.0 - p_t, EPS) ** GAMMA * ce
    alpha_t = ALPHA * t + (1.0 - ALPHA) * (1.0 - t)
    return jnp.sum(alpha_t * loss)


if __name__ == "__main__":
    key = jax.random.PRNGKey(0)
    k1, k2 = jax.random.split(key)
    B, C, H, W = 2, 4, 16, 16  # NCHW, matches segmentation logits layout
    logits = jax.random.normal(k1, (B, C, H, W), dtype=jnp.float32) * 5.0
    targets = (jax.random.uniform(k2, (B, C, H, W)) > 0.5).astype(jnp.float32)

    out = focal_loss(logits, targets)
    out = jax.block_until_ready(out)

    ref = _focal_loss_ref(logits, targets)
    # Slightly looser tolerance: approx EUP reciprocal inside the kernel.
    assert jnp.allclose(out, ref, rtol=2e-3, atol=1e-3), (out, ref)
    print("KERNEL_OK")
</pallas_src>

<mosaic_0001>
module attributes {stable_mosaic.version = 11 : i64} {
  func.func @kernel(%arg0: i32, %arg1: i32, %arg2: memref<16x128xf32, #tpu.memory_space<vmem>>, %arg3: memref<16x128xf32, #tpu.memory_space<vmem>>, %arg4: memref<1x8x128xf32, #tpu.memory_space<vmem>>, %arg5: memref<8x128xf32, #tpu.memory_space<vmem>>) attributes {dimension_semantics = [#tpu.dimension_semantics<parallel>, #tpu.dimension_semantics<arbitrary>], iteration_bounds = array<i64: 1, 1>, scalar_prefetch = 0 : i64, scratch_operands = 1 : i64, tpu.core_type = #tpu.core_type<tc>, window_params = [{transform_indices = @transform_0, window_bounds = array<i64: 16, 128>}, {transform_indices = @transform_1, window_bounds = array<i64: 16, 128>}, {transform_indices = @transform_2, window_bounds = array<i64: 1, 8, 128>}]} {
    %c0_i32 = arith.constant 0 : i32
    %0 = arith.cmpi eq, %arg1, %c0_i32 : i32
    %1 = arith.extui %0 : i1 to i32
    %c0_i32_0 = arith.constant 0 : i32
    %2 = arith.cmpi ne, %1, %c0_i32_0 : i32
    scf.if %2 {
      %cst_17 = arith.constant 0.000000e+00 : f32
      %39 = vector.broadcast %cst_17 : f32 to vector<8x128xf32>
      %c0_18 = arith.constant 0 : index
      %c0_19 = arith.constant 0 : index
      %40 = vector.load %arg5[%c0_18, %c0_19] : memref<8x128xf32, #tpu.memory_space<vmem>>, vector<8x128xf32>
      tpu.vector_store %arg5[%c0_18, %c0_19], %39 {strides = array<i32>} : memref<8x128xf32, #tpu.memory_space<vmem>>, vector<8x128xf32>,
    } else {
    }
    %c0 = arith.constant 0 : index
    %c0_1 = arith.constant 0 : index
    %3 = vector.load %arg2[%c0, %c0_1] : memref<16x128xf32, #tpu.memory_space<vmem>>, vector<16x128xf32>
    %c0_2 = arith.constant 0 : index
    %c0_3 = arith.constant 0 : index
    %4 = vector.load %arg3[%c0_2, %c0_3] : memref<16x128xf32, #tpu.memory_space<vmem>>, vector<16x128xf32>
    %cst = arith.constant -2.000000e+01 : f32
    %cst_4 = arith.constant 2.000000e+01 : f32
    %5 = vector.broadcast %cst : f32 to vector<16x128xf32>
    %6 = arith.maximumf %5, %3 : vector<16x128xf32>
    %7 = vector.broadcast %cst_4 : f32 to vector<16x128xf32>
    %8 = arith.minimumf %7, %6 : vector<16x128xf32>
    %9 = math.absf %8 : vector<16x128xf32>
    %cst_5 = arith.constant 0.000000e+00 : f32
    %10 = vector.broadcast %cst_5 : f32 to vector<16x128xf32>
    %11 = arith.subf %10, %9 : vector<16x128xf32>
    %12 = math.exp %11 : vector<16x128xf32>
    %cst_6 = arith.constant 1.000000e+00 : f32
    %13 = vector.broadcast %cst_6 : f32 to vector<16x128xf32>
    %14 = arith.addf %13, %12 : vector<16x128xf32>
    %15 = tpu.reciprocal %14 {approx = true} : vector<16x128xf32> -> vector<16x128xf32>
    %cst_7 = arith.constant 0.000000e+00 : f32
    %16 = vector.broadcast %cst_7 : f32 to vector<16x128xf32>
    %17 = arith.maximumf %8, %16 : vector<16x128xf32>
    %18 = arith.mulf %8, %4 : vector<16x128xf32>
    %19 = arith.subf %17, %18 : vector<16x128xf32>
    %20 = math.log1p %12 : vector<16x128xf32>
    %21 = arith.addf %19, %20 : vector<16x128xf32>
    %cst_8 = arith.constant 0.000000e+00 : f32
    %22 = vector.broadcast %cst_8 : f32 to vector<16x128xf32>
    %23 = arith.cmpf oge, %8, %22 : vector<16x128xf32>
    %24 = arith.mulf %12, %15 : vector<16x128xf32>
    %25 = arith.select %23, %24, %15 : vector<16x128xi1>, vector<16x128xf32>
    %cst_9 = arith.constant 9.99999997E-7 : f32
    %26 = vector.broadcast %cst_9 : f32 to vector<16x128xf32>
    %27 = arith.maximumf %25, %26 : vector<16x128xf32>
    %28 = arith.mulf %27, %27 : vector<16x128xf32>
    %29 = arith.mulf %28, %21 : vector<16x128xf32>
    %30 = arith.mulf %4, %29 : vector<16x128xf32>
    %c0_10 = arith.constant 0 : index
    %c0_11 = arith.constant 0 : index
    %31 = vector.load %arg5[%c0_10, %c0_11] : memref<8x128xf32, #tpu.memory_space<vmem>>, vector<8x128xf32>
    %32 = vector.shape_cast %30 : vector<16x128xf32> to vector<2x8x128xf32>
    %cst_12 = arith.constant dense<0.000000e+00> : vector<8x128xf32>
    %33 = vector.multi_reduction <add>, %32, %cst_12 [0] : vector<2x8x128xf32> to vector<8x128xf32>
    %34 = arith.addf %31, %33 : vector<8x128xf32>
    %c0_13 = arith.constant 0 : index
    %c0_14 = arith.constant 0 : index
    %35 = vector.load %arg5[%c0_13, %c0_14] : memref<8x128xf32, #tpu.memory_space<vmem>>, vector<8x128xf32>
    tpu.vector_store %arg5[%c0_13, %c0_14], %34 {strides = array<i32>} : memref<8x128xf32, #tpu.memory_space<vmem>>, vector<8x128xf32>,
    %c0_i32_15 = arith.constant 0 : i32
    %36 = arith.cmpi eq, %arg1, %c0_i32_15 : i32
    %37 = arith.extui %36 : i1 to i32
    %c0_i32_16 = arith.constant 0 : i32
    %38 = arith.cmpi ne, %37, %c0_i32_16 : i32
    scf.if %38 {
      %c0_17 = arith.constant 0 : index
      %c0_18 = arith.constant 0 : index
      %39 = vector.load %arg5[%c0_17, %c0_18] : memref<8x128xf32, #tpu.memory_space<vmem>>, vector<8x128xf32>
      %40 = vector.shape_cast %39 : vector<8x128xf32> to vector<1x8x128xf32>
      %c0_19 = arith.constant 0 : index
      %c0_20 = arith.constant 0 : index
      %c0_21 = arith.constant 0 : index
      %41 = vector.load %arg4[%c0_19, %c0_20, %c0_21] : memref<1x8x128xf32, #tpu.memory_space<vmem>>, vector<1x8x128xf32>
      tpu.vector_store %arg4[%c0_19, %c0_20, %c0_21], %40 {strides = array<i32>} : memref<1x8x128xf32, #tpu.memory_space<vmem>>, vector<1x8x128xf32>,
    } else {
    }
    return
  }
  func.func @transform_0(%arg0: i32, %arg1: i32) -> (i32, i32) {
    %c1_i32 = arith.constant 1 : i32
    %0 = arith.muli %arg0, %c1_i32 : i32
    %1 = arith.addi %0, %arg1 : i32
    %c0_i32 = arith.constant 0 : i32
    %2 = arith.minsi %1, %c0_i32 : i32
    %c0_i32_0 = arith.constant 0 : i32
    %c0_i32_1 = arith.constant 0 : i32
    return %2, %c0_i32_0 : i32, i32
  }
  func.func @transform_1(%arg0: i32, %arg1: i32) -> (i32, i32) {
    %c1_i32 = arith.constant 1 : i32
    %0 = arith.muli %arg0, %c1_i32 : i32
    %1 = arith.addi %0, %arg1 : i32
    %c0_i32 = arith.constant 0 : i32
    %2 = arith.minsi %1, %c0_i32 : i32
    %c0_i32_0 = arith.constant 0 : i32
    %c0_i32_1 = arith.constant 0 : i32
    return %2, %c0_i32_0 : i32, i32
  }
  func.func @transform_2(%arg0: i32, %arg1: i32) -> (i32, i32, i32) {
    %c0_i32 = arith.constant 0 : i32
    %c0_i32_0 = arith.constant 0 : i32
    %c0_i32_1 = arith.constant 0 : i32
    return %arg0, %c0_i32, %c0_i32_0 : i32, i32, i32
  }
}

</mosaic_0001>

<bundles_post_ra>
// kernel: focal_loss.1
= control target key start
LH: loop header
LB: loop body
LE: loop exit
PB: predicated region body
PF: predicated region fallthrough
CT: control target
= control target key end

     0   :  { %s209_s0 = inlined_call_operand.vmem [shape: f32[16,128], index: 0, kind: input, shape index: {}]   ;;  %s210_s1 = inlined_call_operand.vmem [shape: f32[16,128], index: 1, kind: input, shape index: {}]   ;;  %s211_s2 = inlined_call_operand.vmem [shape: f32[1,8,128], index: 2, kind: output, shape index: {}]  }
   0x1   :  { %v80_v0 = vld [vmem:[%s209_s0] sm:$0xff]  ;;  %v81_v1 = vld [vmem:[%s209_s0 + $0x8] sm:$0xff] }
   0x2   :  { %v165_v2 = vclamps-f32 %v80_v0, 20.0  ;;  %v166_v3 = vclamps-f32 %v81_v1, 20.0  ;;  %v82_v16 = vld [vmem:[%s210_s1] sm:$0xff]  ;;  %v83_v17 = vld [vmem:[%s210_s1 + $0x8] sm:$0xff] }
   0x4   :  { %v88_v4 = vand.u32 2147483647, %v165_v2  ;;  %v89_v5 = vand.u32 2147483647, %v166_v3  ;;  %v100_v19 = vmax.f32 %v165_v2, 0.0  ;;  %v102_v20 = vmul.f32 %v165_v2, %v82_v16 }
   0x5   :  { %v101_v23 = vmax.f32 %v166_v3, 0.0  ;;  %v103_v24 = vmul.f32 %v166_v3, %v83_v17  ;;  %vm126_vm0 = vcmp.ge.f32.partialorder %v165_v2, 0.0  ;;  %vm127_vm1 = vcmp.ge.f32.partialorder %v166_v3, 0.0 }
   0x6   :  { %v90_v6 = vsub.f32 0.0, %v88_v4  ;;  %v91_v7 = vsub.f32 0.0, %v89_v5  ;;  %v104_v31 = vsub.f32 %v100_v19, %v102_v20 }
   0x7   :  { %v105_v35 = vsub.f32 %v101_v23, %v103_v24 }
   0x8   :  { %v92_v8 = vmul.f32 1.442695, %v90_v6  ;;  %v94_v9 = vmul.f32 1.442695, %v91_v7 }
   0xa   :  { %167 = vpow2.f32 %v92_v8 }
   0xb   :  { %169 = vpow2.f32 %v94_v9 }
  0x14   :  { %v168_v10 = vpop.eup %167 }
  0x15   :  { %v170_v11 = vpop.eup %169  ;;  %v96_v12 = vadd.f32 1.0, %v168_v10  ;;  %v109_v14 = vmul.f32 -0.5, %v168_v10  ;;  %v112_v21 = vand.u32 2147483647, %v168_v10 }
  0x16   :  { %v97_v13 = vadd.f32 1.0, %v170_v11  ;;  %v118_v15 = vmul.f32 -0.5, %v170_v11  ;;  %v121_v25 = vand.u32 2147483647, %v170_v11 }
  0x17   :  { %171 = vrcp.f32 %v96_v12  ;;  %v110_v18 = vadd.f32 1.0, %v109_v14  ;;  %vm113_vm2 = vcmp.lt.f32.partialorder %v112_v21, 0.0004427343 }
  0x18   :  { %173 = vrcp.f32 %v97_v13  ;;  %v119_v22 = vadd.f32 1.0, %v118_v15  ;;  %vm122_vm3 = vcmp.lt.f32.partialorder %v121_v25, 0.0004427343 }
  0x19   :  { %175 = vlog2.f32 %v96_v12  ;;  %v111_v28 = vmul.f32 %v168_v10, %v110_v18 }
  0x1a   :  { %177 = vlog2.f32 %v97_v13  ;;  %v120_v32 = vmul.f32 %v170_v11, %v119_v22 }
  0x21   :  { %v172_v26 = vpop.eup %171 }
  0x22   :  { %v174_v27 = vpop.eup %173  ;;  %v128_v29 = vmul.f32 %v172_v26, %v168_v10 }
  0x23   :  { %v176_v30 = vpop.eup %175  ;;  %v129_v33 = vmul.f32 %v174_v27, %v170_v11 }
  0x24   :  { %v178_v34 = vpop.eup %177  ;;  %v108_v36 = vmul.f32 0.6931472, %v176_v30  ;;  %v130_v37 = vsel %vm126_vm0, %v128_v29, %v172_v26 }
  0x25   :  { %v117_v38 = vmul.f32 0.6931472, %v178_v34  ;;  %v131_v39 = vsel %vm127_vm1, %v129_v33, %v174_v27  ;;  %v132_v40 = vmax.f32 %v130_v37, 1e-06 }
  0x26   :  { %v114_v41 = vsel %vm113_vm2, %v111_v28, %v108_v36  ;;  %v133_v42 = vmax.f32 %v131_v39, 1e-06 }
  0x27   :  { %v123_v43 = vsel %vm122_vm3, %v120_v32, %v117_v38  ;;  %v124_v44 = vadd.f32 %v114_v41, %v104_v31  ;;  %v134_v45 = vmul.f32 %v132_v40, %v132_v40 }
  0x28   :  { %v125_v46 = vadd.f32 %v123_v43, %v105_v35  ;;  %v135_v47 = vmul.f32 %v133_v42, %v133_v42 }
  0x29   :  { %v136_v48 = vmul.f32 %v134_v45, %v124_v44 }
  0x2a   :  { %v137_v49 = vmul.f32 %v135_v47, %v125_v46 }
  0x2b   :  { %v138_v50 = vmul.f32 %v136_v48, %v82_v16 }
  0x2c   :  { %v139_v51 = vmul.f32 %v137_v49, %v83_v17 }
  0x2e   :  { %v141_v52 = vadd.f32 %v139_v51, %v138_v50 }
  0x30   :  { %148 = vst [vmem:[%s211_s2] sm:$0xff] %v141_v52 }

</bundles_post_ra>
